<compile_context>
chip_gen: v6e
topology: v6e:2x2x1
jax: 0.10.0
libtpu: 0.0.40
codegen_flags: <defaults>
</compile_context>

<pallas_src>
import jax
import jax.numpy as jnp
from jax.experimental import pallas as pl
from jax.experimental.pallas import tpu as pltpu


def _lsa_kernel(enc_ref, sh_ref, wd_ref, bias_ref, vw_ref, vb_ref, fu_ref,
                ow_ref, ob_ref, ctx_ref, aw_ref):
    bb, t_len, e_dim = enc_ref.shape
    k_taps = sh_ref.shape[-1]
    h_dim = vw_ref.shape[-1]

    enc = enc_ref[...].astype(jnp.float32)      # (Bb, T, E)
    sh = sh_ref[...].astype(jnp.float32)        # (Bb, T, K)
    wd = wd_ref[...].astype(jnp.float32)        # (Bb, H)  -- W(decoder_state), precomputed

    # Fold batch into the matmul M dimension: V(enc) + U(F(att_prev)) as two MXU dots.
    enc2 = enc.reshape(bb * t_len, e_dim)
    sh2 = sh.reshape(bb * t_len, k_taps)
    pre2 = jnp.dot(enc2, vw_ref[...], preferred_element_type=jnp.float32)
    pre2 = pre2 + jnp.dot(sh2, fu_ref[...], preferred_element_type=jnp.float32)
    pre2 = pre2 + vb_ref[...]                                   # (1, H) broadcast
    pre = pre2.reshape(bb, t_len, h_dim) + wd[:, None, :]       # add decoder term
    s = jnp.tanh(pre)                                           # (Bb, T, H)

    # Score projection: VPU multiply + lane reduction (avoids an N=1 matmul).
    # The bias ob cancels under softmax but is kept for fidelity (SMEM scalar).
    erg = jnp.sum(s * ow_ref[...], axis=-1) + ob_ref[0]         # (Bb, T)
    erg = erg + bias_ref[...]                                   # additive mask (0 / -inf)

    # Softmax over T (lane axis).
    m = jnp.max(erg, axis=-1, keepdims=True)
    e = jnp.exp(erg - m)
    denom = jnp.sum(e, axis=-1, keepdims=True)
    aw = e * pl.reciprocal(denom, approx=True)                  # (Bb, T)

    # Context as a batched (1, T) x (T, E) MXU matmul.
    ctx = jnp.einsum('bqt,bte->bqe', aw[:, None, :], enc,
                     preferred_element_type=jnp.float32)        # (Bb, 1, E)

    ctx_ref[...] = ctx[:, 0, :].astype(ctx_ref.dtype)
    aw_ref[...] = aw.astype(aw_ref.dtype)


def location_sensitive_attention(encoder_outs, src_lens, decoder_state, params,
                                 att_prev=None, mask=None, block_b=None):
    """Fused forward. Returns (attention_context (B, E), attention_weights (B, T))."""
    B, T, E = encoder_outs.shape
    K, C = params["Fw"].shape
    H = params["Vw"].shape[1]
    assert K % 2 == 1, "conv kernel size must be odd for 'same' padding"
    pad = (K - 1) // 2
    out_dtype = encoder_outs.dtype

    if att_prev is None:
        t_idx = jnp.arange(T)[None, :]
        not_pad = (t_idx < src_lens[:, None]).astype(encoder_outs.dtype)
        att_prev = not_pad / src_lens[:, None].astype(encoder_outs.dtype)

    # Shifted windows so the conv + U projection is one matmul against FU = Fw @ Uw.
    att_pad = jnp.pad(att_prev.astype(jnp.float32), ((0, 0), (pad, pad)))
    att_shift = jnp.stack([att_pad[:, k:k + T] for k in range(K)], axis=-1)   # (B, T, K)

    # Hoisted projections / weight folds (one XLA matmul each, done once).
    wd = jnp.dot(decoder_state.astype(jnp.float32),
                 params["Ww"].astype(jnp.float32))                            # (B, H)
    fu = jnp.dot(params["Fw"].astype(jnp.float32),
                 params["Uw"].astype(jnp.float32))                            # (K, H)
    vw = params["Vw"].astype(jnp.float32)
    vb_row = params["Vb"].astype(jnp.float32).reshape(1, H)
    ow_row = params["ow"].astype(jnp.float32).reshape(1, H)
    ob = params["ob"].astype(jnp.float32).reshape(1)

    if mask is None:
        bias = jnp.zeros((B, T), jnp.float32)
    else:
        bias = jnp.where(mask, -jnp.inf, 0.0).astype(jnp.float32)

    enc = encoder_outs.astype(jnp.float32)

    # Batch-block size: fold as many batch rows as comfortably fit in VMEM
    # (~4 MiB per block; with double-buffering this stays under the default
    #  scoped-VMEM limit on v5e/v6e/v7x — raise vmem_limit_bytes to go bigger).
    if block_b is not None:
        bb = block_b
    else:
        per_b_bytes = 4 * (T * (E + K + 2) + H + E)
        bb = max(1, (4 << 20) // per_b_bytes)
    if bb >= B:
        bb = B                       # single grid step covers the whole batch
    else:
        bb = max(8, (bb // 8) * 8)   # keep second-minor block dims 8-aligned
    B_pad = pl.cdiv(B, bb) * bb

    if B_pad != B:
        pb = B_pad - B
        enc = jnp.pad(enc, ((0, pb), (0, 0), (0, 0)))
        att_shift = jnp.pad(att_shift, ((0, pb), (0, 0), (0, 0)))
        wd = jnp.pad(wd, ((0, pb), (0, 0)))
        bias = jnp.pad(bias, ((0, pb), (0, 0)))

    grid = (B_pad // bb,)
    full2 = lambda shape: pl.BlockSpec(shape, lambda i: (0, 0))

    ctx, aw = pl.pallas_call(
        _lsa_kernel,
        out_shape=(jax.ShapeDtypeStruct((B_pad, E), out_dtype),
                   jax.ShapeDtypeStruct((B_pad, T), out_dtype)),
        grid_spec=pltpu.PrefetchScalarGridSpec(
            num_scalar_prefetch=0,
            grid=grid,
            in_specs=[
                pl.BlockSpec((bb, T, E), lambda i: (i, 0, 0)),   # encoder_outs
                pl.BlockSpec((bb, T, K), lambda i: (i, 0, 0)),   # shifted att_prev windows
                pl.BlockSpec((bb, H), lambda i: (i, 0)),         # W(decoder_state)
                pl.BlockSpec((bb, T), lambda i: (i, 0)),         # additive mask bias
                full2((E, H)),                                   # Vw
                full2((1, H)),                                   # Vb
                full2((K, H)),                                   # FU = Fw @ Uw
                full2((1, H)),                                   # w row
                pl.BlockSpec(memory_space=pltpu.MemorySpace.SMEM),  # ob scalar
            ],
            out_specs=[
                pl.BlockSpec((bb, E), lambda i: (i, 0)),         # context (lane-dense)
                pl.BlockSpec((bb, T), lambda i: (i, 0)),         # attention weights
            ],
        ),
        compiler_params=pltpu.CompilerParams(dimension_semantics=("parallel",)),
    )(enc, att_shift, wd, bias, vw, vb_row, fu, ow_row, ob)

    return ctx[:B], aw[:B]


def _reference(encoder_outs, src_lens, decoder_state, params, mask=None):
    """Pure-JAX reference reproducing the PyTorch forward (att_prev=None)."""
    B, T, E = encoder_outs.shape
    K, C = params["Fw"].shape
    pad = (K - 1) // 2
    t_idx = jnp.arange(T)[None, :]
    not_pad = (t_idx < src_lens[:, None]).astype(encoder_outs.dtype)
    att_prev = not_pad / src_lens[:, None].astype(encoder_outs.dtype)

    w_conv = params["Fw"].T[:, None, :]   # (C, 1, K) == PyTorch layout
    f = jax.lax.conv_general_dilated(
        att_prev[:, None, :], w_conv, window_strides=(1,),
        padding=[(pad, pad)], dimension_numbers=("NCH", "OIH", "NCH"))
    f = jnp.transpose(f, (0, 2, 1))       # (B, T, C)

    wd = decoder_state @ params["Ww"]                       # (B, H)
    ve = encoder_outs @ params["Vw"] + params["Vb"]         # (B, T, H)
    uf = f @ params["Uw"]                                   # (B, T, H)
    erg = jnp.tanh(wd[:, None, :] + ve + uf) @ params["ow"] + params["ob"]  # (B, T, 1)
    erg = erg[..., 0]
    if mask is not None:
        erg = jnp.where(mask, -jnp.inf, erg)
    aw = jax.nn.softmax(erg, axis=1)
    ctx = jnp.sum(encoder_outs * aw[..., None], axis=1)
    return ctx, aw


if __name__ == "__main__":
    # Small shapes consistent with the module's forward.
    B, T = 2, 16
    E, D, H, C, K = 32, 64, 16, 8, 7

    key = jax.random.PRNGKey(0)
    keys = jax.random.split(key, 10)
    params = {
        "Vw": 0.1 * jax.random.normal(keys[0], (E, H), jnp.float32),
        "Vb": 0.1 * jax.random.normal(keys[1], (1, H), jnp.float32),
        "Ww": 0.1 * jax.random.normal(keys[2], (D, H), jnp.float32),
        "Uw": 0.1 * jax.random.normal(keys[3], (C, H), jnp.float32),
        "Fw": 0.1 * jax.random.normal(keys[4], (K, C), jnp.float32),
        "ow": 0.1 * jax.random.normal(keys[5], (H, 1), jnp.float32),
        "ob": 0.1 * jax.random.normal(keys[6], (1, 1), jnp.float32),
    }

    encoder_outs = jax.random.normal(keys[7], (B, T, E), jnp.float32)
    decoder_state = jax.random.normal(keys[8], (B, D), jnp.float32)
    src_lens = jnp.array([T, T - 4], dtype=jnp.int32)

    # --- mask=None path (matches PyTorch forward with mask=None) ---
    ctx, aw = location_sensitive_attention(encoder_outs, src_lens, decoder_state, params)
    jax.block_until_ready(ctx)
    jax.block_until_ready(aw)

    ctx_ref, aw_ref = _reference(encoder_outs, src_lens, decoder_state, params)
    assert jnp.allclose(ctx, ctx_ref, atol=2e-3, rtol=2e-3), "context mismatch"
    assert jnp.allclose(aw, aw_ref, atol=2e-3, rtol=2e-3), "attention weights mismatch"
    assert jnp.allclose(jnp.sum(aw, axis=1), 1.0, atol=5e-3), "softmax not normalized"

    # --- masked path (mask = padded positions) ---
    mask = jnp.arange(T)[None, :] >= src_lens[:, None]
    ctx_m, aw_m = location_sensitive_attention(encoder_outs, src_lens, decoder_state,
                                               params, mask=mask)
    jax.block_until_ready(ctx_m)
    ctx_mr, aw_mr = _reference(encoder_outs, src_lens, decoder_state, params, mask=mask)
    assert jnp.allclose(ctx_m, ctx_mr, atol=2e-3, rtol=2e-3), "masked context mismatch"
    assert jnp.allclose(aw_m, aw_mr, atol=2e-3, rtol=2e-3), "masked weights mismatch"
    assert jnp.allclose(aw_m[1, T - 4:], 0.0, atol=1e-6), "masked positions not zero"

    print("KERNEL_OK")
</pallas_src>

<mosaic_0001>
module attributes {stable_mosaic.version = 11 : i64} {
  func.func @_lsa_kernel(%arg0: i32, %arg1: memref<2x16x32xf32, #tpu.memory_space<vmem>>, %arg2: memref<2x16x7xf32, #tpu.memory_space<vmem>>, %arg3: memref<2x16xf32, #tpu.memory_space<vmem>>, %arg4: memref<2x16xf32, #tpu.memory_space<vmem>>, %arg5: memref<32x16xf32, #tpu.memory_space<vmem>>, %arg6: memref<1x16xf32, #tpu.memory_space<vmem>>, %arg7: memref<7x16xf32, #tpu.memory_space<vmem>>, %arg8: memref<1x16xf32, #tpu.memory_space<vmem>>, %arg9: memref<1xf32, #tpu.memory_space<smem>>, %arg10: memref<2x32xf32, #tpu.memory_space<vmem>>, %arg11: memref<2x16xf32, #tpu.memory_space<vmem>>) attributes {dimension_semantics = [#tpu.dimension_semantics<parallel>], iteration_bounds = array<i64: 1>, scalar_prefetch = 0 : i64, scratch_operands = 0 : i64, tpu.core_type = #tpu.core_type<tc>, window_params = [{transform_indices = @transform_0, window_bounds = array<i64: 2, 16, 32>}, {transform_indices = @transform_1, window_bounds = array<i64: 2, 16, 7>}, {transform_indices = @transform_2, window_bounds = array<i64: 2, 16>}, {transform_indices = @transform_3, window_bounds = array<i64: 2, 16>}, {pipeline_mode = #tpu.pipeline_mode<synchronous>, transform_indices = @transform_4, window_bounds = array<i64: 32, 16>}, {pipeline_mode = #tpu.pipeline_mode<synchronous>, transform_indices = @transform_5, window_bounds = array<i64: 1, 16>}, {pipeline_mode = #tpu.pipeline_mode<synchronous>, transform_indices = @transform_6, window_bounds = array<i64: 7, 16>}, {pipeline_mode = #tpu.pipeline_mode<synchronous>, transform_indices = @transform_7, window_bounds = array<i64: 1, 16>}, {transform_indices = @transform_8, window_bounds = array<i64: 1>}, {transform_indices = @transform_9, window_bounds = array<i64: 2, 32>}, {transform_indices = @transform_10, window_bounds = array<i64: 2, 16>}]} {
    %c0 = arith.constant 0 : index
    %c0_0 = arith.constant 0 : index
    %c0_1 = arith.constant 0 : index
    %0 = vector.load %arg1[%c0, %c0_0, %c0_1] : memref<2x16x32xf32, #tpu.memory_space<vmem>>, vector<2x16x32xf32>
    %c0_2 = arith.constant 0 : index
    %c0_3 = arith.constant 0 : index
    %c0_4 = arith.constant 0 : index
    %1 = vector.load %arg2[%c0_2, %c0_3, %c0_4] : memref<2x16x7xf32, #tpu.memory_space<vmem>>, vector<2x16x7xf32>
    %c0_5 = arith.constant 0 : index
    %c0_6 = arith.constant 0 : index
    %2 = vector.load %arg3[%c0_5, %c0_6] : memref<2x16xf32, #tpu.memory_space<vmem>>, vector<2x16xf32>
    %3 = vector.shape_cast %0 : vector<2x16x32xf32> to vector<32x32xf32>
    %4 = vector.shape_cast %1 : vector<2x16x7xf32> to vector<32x7xf32>
    %c0_7 = arith.constant 0 : index
    %c0_8 = arith.constant 0 : index
    %5 = vector.load %arg5[%c0_7, %c0_8] : memref<32x16xf32, #tpu.memory_space<vmem>>, vector<32x16xf32>
    %cst = arith.constant dense<0.000000e+00> : vector<32x16xf32>
    %6 = tpu.matmul %3, %5, %cst {dimension_numbers = #tpu.dot_dimension_numbers<[1], [0], [0], [1], [0, 0, 1, 1], [], []>} : vector<32x32xf32>, vector<32x16xf32>, vector<32x16xf32> -> vector<32x16xf32>
    %c0_9 = arith.constant 0 : index
    %c0_10 = arith.constant 0 : index
    %7 = vector.load %arg7[%c0_9, %c0_10] : memref<7x16xf32, #tpu.memory_space<vmem>>, vector<7x16xf32>
    %cst_11 = arith.constant dense<0.000000e+00> : vector<32x16xf32>
    %8 = tpu.matmul %4, %7, %cst_11 {dimension_numbers = #tpu.dot_dimension_numbers<[1], [0], [0], [1], [0, 0, 1, 1], [], []>} : vector<32x7xf32>, vector<7x16xf32>, vector<32x16xf32> -> vector<32x16xf32>
    %9 = arith.addf %6, %8 : vector<32x16xf32>
    %c0_12 = arith.constant 0 : index
    %c0_13 = arith.constant 0 : index
    %10 = vector.load %arg6[%c0_12, %c0_13] : memref<1x16xf32, #tpu.memory_space<vmem>>, vector<1x16xf32>
    %11 = vector.broadcast %10 : vector<1x16xf32> to vector<32x16xf32>
    %12 = arith.addf %9, %11 : vector<32x16xf32>
    %13 = vector.shape_cast %12 : vector<32x16xf32> to vector<2x16x16xf32>
    %14 = vector.shape_cast %2 : vector<2x16xf32> to vector<2x1x16xf32>
    %15 = vector.broadcast %14 : vector<2x1x16xf32> to vector<2x16x16xf32>
    %16 = arith.addf %13, %15 : vector<2x16x16xf32>
    %17 = math.tanh %16 : vector<2x16x16xf32>
    %c0_14 = arith.constant 0 : index
    %c0_15 = arith.constant 0 : index
    %18 = vector.load %arg8[%c0_14, %c0_15] : memref<1x16xf32, #tpu.memory_space<vmem>>, vector<1x16xf32>
    %19 = vector.shape_cast %18 : vector<1x16xf32> to vector<1x1x16xf32>
    %20 = vector.broadcast %19 : vector<1x1x16xf32> to vector<2x16x16xf32>
    %21 = arith.mulf %17, %20 : vector<2x16x16xf32>
    %cst_16 = arith.constant dense<0.000000e+00> : vector<2x16xf32>
    %22 = vector.multi_reduction <add>, %21, %cst_16 [2] : vector<2x16x16xf32> to vector<2x16xf32>
    %c0_17 = arith.constant 0 : index
    %23 = memref.load %arg9[%c0_17] : memref<1xf32, #tpu.memory_space<smem>>
    %24 = vector.broadcast %23 : f32 to vector<2x16xf32>
    %25 = arith.addf %22, %24 : vector<2x16xf32>
    %c0_18 = arith.constant 0 : index
    %c0_19 = arith.constant 0 : index
    %26 = vector.load %arg4[%c0_18, %c0_19] : memref<2x16xf32, #tpu.memory_space<vmem>>, vector<2x16xf32>
    %27 = arith.addf %25, %26 : vector<2x16xf32>
    %cst_20 = arith.constant dense<0xFF800000> : vector<2xf32>
    %28 = vector.multi_reduction <maximumf>, %27, %cst_20 [1] : vector<2x16xf32> to vector<2xf32>
    %29 = vector.shape_cast %28 : vector<2xf32> to vector<2x1xf32>
    %30 = vector.broadcast %29 : vector<2x1xf32> to vector<2x16xf32>
    %31 = arith.subf %27, %30 : vector<2x16xf32>
    %32 = math.exp %31 : vector<2x16xf32>
    %cst_21 = arith.constant dense<0.000000e+00> : vector<2xf32>
    %33 = vector.multi_reduction <add>, %32, %cst_21 [1] : vector<2x16xf32> to vector<2xf32>
    %34 = vector.shape_cast %33 : vector<2xf32> to vector<2x1xf32>
    %35 = tpu.reciprocal %34 {approx = true} : vector<2x1xf32> -> vector<2x1xf32>
    %36 = vector.broadcast %35 : vector<2x1xf32> to vector<2x16xf32>
    %37 = arith.mulf %32, %36 : vector<2x16xf32>
    %38 = vector.shape_cast %37 : vector<2x16xf32> to vector<2x1x16xf32>
    "tpu.trace_start"() <{level = 10 : i32, message = "bqt,bte->bqe"}> : () -> ()
    %cst_22 = arith.constant dense<0.000000e+00> : vector<2x1x32xf32>
    %39 = tpu.matmul %38, %0, %cst_22 {dimension_numbers = #tpu.dot_dimension_numbers<[2], [1], [1], [2], [0, 0, 0, 1, 1, 2], [0], [0]>} : vector<2x1x16xf32>, vector<2x16x32xf32>, vector<2x1x32xf32> -> vector<2x1x32xf32>
    "tpu.trace_stop"() : () -> ()
    %40 = vector.shape_cast %39 : vector<2x1x32xf32> to vector<2x32xf32>
    %c0_23 = arith.constant 0 : index
    %c0_24 = arith.constant 0 : index
    %41 = vector.load %arg10[%c0_23, %c0_24] : memref<2x32xf32, #tpu.memory_space<vmem>>, vector<2x32xf32>
    tpu.vector_store %arg10[%c0_23, %c0_24], %40 {strides = array<i32>} : memref<2x32xf32, #tpu.memory_space<vmem>>, vector<2x32xf32>,
    %c0_25 = arith.constant 0 : index
    %c0_26 = arith.constant 0 : index
    %42 = vector.load %arg11[%c0_25, %c0_26] : memref<2x16xf32, #tpu.memory_space<vmem>>, vector<2x16xf32>
    tpu.vector_store %arg11[%c0_25, %c0_26], %37 {strides = array<i32>} : memref<2x16xf32, #tpu.memory_space<vmem>>, vector<2x16xf32>,
    return
  }
  func.func @transform_0(%arg0: i32) -> (i32, i32, i32) {
    %c0_i32 = arith.constant 0 : i32
    %c0_i32_0 = arith.constant 0 : i32
    %c0_i32_1 = arith.constant 0 : i32
    return %arg0, %c0_i32, %c0_i32_0 : i32, i32, i32
  }
  func.func @transform_1(%arg0: i32) -> (i32, i32, i32) {
    %c0_i32 = arith.constant 0 : i32
    %c0_i32_0 = arith.constant 0 : i32
    %c0_i32_1 = arith.constant 0 : i32
    return %arg0, %c0_i32, %c0_i32_0 : i32, i32, i32
  }
  func.func @transform_2(%arg0: i32) -> (i32, i32) {
    %c0_i32 = arith.constant 0 : i32
    %c0_i32_0 = arith.constant 0 : i32
    return %arg0, %c0_i32 : i32, i32
  }
  func.func @transform_3(%arg0: i32) -> (i32, i32) {
    %c0_i32 = arith.constant 0 : i32
    %c0_i32_0 = arith.constant 0 : i32
    return %arg0, %c0_i32 : i32, i32
  }
  func.func @transform_4(%arg0: i32) -> (i32, i32) {
    %c0_i32 = arith.constant 0 : i32
    %c0_i32_0 = arith.constant 0 : i32
    %c0_i32_1 = arith.constant 0 : i32
    return %c0_i32, %c0_i32_0 : i32, i32
  }
  func.func @transform_5(%arg0: i32) -> (i32, i32) {
    %c0_i32 = arith.constant 0 : i32
    %c0_i32_0 = arith.constant 0 : i32
    %c0_i32_1 = arith.constant 0 : i32
    return %c0_i32, %c0_i32_0 : i32, i32
  }
  func.func @transform_6(%arg0: i32) -> (i32, i32) {
    %c0_i32 = arith.constant 0 : i32
    %c0_i32_0 = arith.constant 0 : i32
    %c0_i32_1 = arith.constant 0 : i32
    return %c0_i32, %c0_i32_0 : i32, i32
  }
  func.func @transform_7(%arg0: i32) -> (i32, i32) {
    %c0_i32 = arith.constant 0 : i32
    %c0_i32_0 = arith.constant 0 : i32
    %c0_i32_1 = arith.constant 0 : i32
    return %c0_i32, %c0_i32_0 : i32, i32
  }
  func.func @transform_8(%arg0: i32) -> i32 {
    %c0_i32 = arith.constant 0 : i32
    %c0_i32_0 = arith.constant 0 : i32
    return %c0_i32 : i32
  }
  func.func @transform_9(%arg0: i32) -> (i32, i32) {
    %c0_i32 = arith.constant 0 : i32
    %c0_i32_0 = arith.constant 0 : i32
    return %arg0, %c0_i32 : i32, i32
  }
  func.func @transform_10(%arg0: i32) -> (i32, i32) {
    %c0_i32 = arith.constant 0 : i32
    %c0_i32_0 = arith.constant 0 : i32
    return %arg0, %c0_i32 : i32, i32
  }
}

</mosaic_0001>

<bundles_post_ra>
// kernel: tpu_custom_call.1
= control target key start
LH: loop header
LB: loop body
LE: loop exit
PB: predicated region body
PF: predicated region fallthrough
CT: control target
= control target key end

     0   :  { %17 = vsyncpa [#allocation4], 0  ;;  %vm64_vm0 = vcmask 1046528   ;;  %vm51_vm1 = vcmask 56320   ;;  %v274_v3 = vlaneseq  ;;  %vm153_vm2 = vcmask 261120   ;;  %s1048_s0 = inlined_call_operand.vmem [shape: f32[2,16,32], index: 0, kind: input, shape index: {}]   ;;  %s1049_s1 = inlined_call_operand.vmem [shape: f32[2,16,7], index: 1, kind: input, shape index: {}]   ;;  %s1050_s2 = inlined_call_operand.vmem [shape: f32[2,16], index: 2, kind: input, shape index: {}]   ;;  %s1051_s3 = inlined_call_operand.vmem [shape: f32[2,16], index: 3, kind: input, shape index: {}]   ;;  %s1052_s4 = inlined_call_operand.vmem [shape: f32[32,16], index: 4, kind: input, shape index: {}]   ;;  %s1053_s5 = inlined_call_operand.vmem [shape: f32[1,16], index: 5, kind: input, shape index: {}]   ;;  %s1054_s6 = inlined_call_operand.vmem [shape: f32[7,16], index: 6, kind: input, shape index: {}]   ;;  %s1055_s7 = inlined_call_operand.vmem [shape: f32[1,16], index: 7, kind: input, shape index: {}]   ;;  %s1056_s8 = inlined_call_operand.<no memory space> [shape: f32[1], index: 8, kind: input, shape index: {}]   ;;  %s1057_s9 = inlined_call_operand.hbm [shape: f32[2,32], index: 9, kind: output, shape index: {0}]   ;;  %s1058_s10 = inlined_call_operand.hbm [shape: f32[2,16], index: 10, kind: output, shape index: {1}]  }
   0x1   :  { %v49_v0 = vld [vmem:[%s1052_s4 + $0x18] sm:$0xff]  ;;  %v48_v1 = vld [vmem:[%s1052_s4 + $0x10] sm:$0xff]  ;;  %v50_v2 = vld [vmem:[%s1054_s6] sm:$0x7f] }
   0x2   :  { %745 = vmatprep.subr.mxu1 %v49_v0  ;;  %737 = vmatprep.subr.msk.mxu0 %vm64_vm0, %v50_v2  ;;  %v41_v4 = vld [vmem:[%s1049_s1] sm:$0xff]  ;;  %v42_v5 = vld [vmem:[%s1049_s1 + $0x8] sm:$0xff]  ;;  %v928_v8 = vshrl.u32 %v274_v3, 7  ;;  %v43_v9 = vld [vmem:[%s1049_s1 + $0x10] sm:$0xff] }
   0x3   :  { %746 = vmatpush3.msra.mxu1 %v49_v0  ;;  %v47_v6 = vld [vmem:[%s1052_s4 + $0x8] sm:$0xff]  ;;  %738 = vmatpush3.msk.msra.mxu0 %vm64_vm0, %v50_v2  ;;  %v925_v7 = vld [vmem:[%s1048_s0] sm:$0xff]  ;;  %v44_v13 = vld [vmem:[%s1049_s1 + $0x18] sm:$0xff] }
   0x4   :  { %747 = vmatprep.subr.mxu1 %v48_v1  ;;  %739 = vmatprep.mubr.msk.f32.mxu0 %vm51_vm1, %v41_v4  ;;  %v46_v10 = vld [vmem:[%s1052_s4] sm:$0xff]  ;;  %v939_v11 = vsub.s32 0, %v928_v8  ;;  %v950_v14 = vsub.s32 1, %v928_v8 }
   0x5   :  { %748 = vmatpush3.msra.mxu1 %v48_v1  ;;  %740 = vmatmul.mubr.msk.f32.vlgmr.msra.gmra.mxu0 %vm51_vm1, %v42_v5  ;;  %v333_v12 = vld [vmem:[%s1051_s3] sm:$0x3] }
   0x6   :  { %749 = vmatprep.subr.mxu1 %v47_v6  ;;  %753 = vmatprep.mubr.msk.f32.mxu1 %vm153_vm2, %v925_v7 }
   0x7   :  { %18 = vsyncpa [#allocation6], 0  ;;  %750 = vmatpush3.msra.mxu1 %v47_v6  ;;  %v955_v15 = vld [vmem:[%s1048_s0 + $0x8] sm:$0xff]  ;;  %742 = vmatprep.mubr.msk.f32.mxu0 %vm51_vm1, %v43_v9  ;;  %v959_v16 = vrot.slane %v333_v12, %v939_v11  ;;  %v964_v17 = vld [vmem:[%s1048_s0 + $0x10] sm:$0xff]  ;;  %v349_v18 = vrot.slane %v333_v12, %v950_v14  ;;  %v843_v20 = vmov 1966171168   ;;  %v328_v2 = vstv %s1056_s8 }
   0x8   :  { %751 = vmatprep.subr.mxu1 %v46_v10  ;;  %v976_v19 = vld [vmem:[%s1048_s0 + $0x18] sm:$0xff]  ;;  %v272_v21 = vunpack.c.l.s4 %v843_v20  ;;  %v714_v24 = vld.sshfl [vmem:[%s1050_s2] sm:$0x11 pattern:$0x75316420]  ;;  %vm314_vm3 = vcmask 130048  }
   0x9   :  { %752 = vmatpush3.msra.mxu1 %v46_v10  ;;  %743 = vmatmul.mubr.msk.f32.gmra.mxu0 %vm51_vm1, %v44_v13  ;;  %v270_v27 = vcombine.high %v714_v24, %v714_v24  ;;  %v713_v30 = vld [vmem:[%s1053_s5] ss:$0 sm:$0xff]  ;;  %v844_v0 = vmov 0   ;;  %vm392_vm4 = vcmask 130112   ;;  %vm403_vm5 = vcmask 1041409   ;;  %s847_s8 = smov [#allocation5]  }
   0xa   :  { %754 = vmatmul.mubr.msk.f32.vlgmr.msra.gmra.mxu1 %vm153_vm2, %v955_v15  ;;  %344 = vbcast.lane.b32.xlu1 %v959_v16, 264  ;;  %v273_v22 = vunpack.c.0.s8 %v272_v21  ;;  %v715_v51 = vld [vmem:[%s1055_s7] ss:$0 sm:$0xff]  ;;  %vm406_vm6 = vcmask 123904   ;;  %vm846_vm7 = vmmov 0   ;;  %s692_s21 = sshll.u32 %s847_s8, 4  ;;  %s693_s21 = int_to_ptr.vmem [resolvable:$true] %s692_s21 }
   0xb   :  { %756 = vmatprep.mubr.msk.f32.mxu1 %vm153_vm2, %v964_v17  ;;  %779 = vset.pattern.permute.xlu1 %v844_v0  ;;  %s799_s22 = scalar_lea.vmem %s693_s21, 32  ;;  %p804_p1 = scmp.lt.s32.totalorder %s693_s21, %s693_s21 }
   0xc   :  { %v276_v23 = vsub.s32 %v273_v22, %v928_v8  ;;  %780 = vset.pattern.permute.xlu0 %v844_v0  ;;  %p800_p0 = scmp.ne.s32.totalorder %s693_s21, %s799_s22  ;;  %p805_p2 = scmp.lt.s32.totalorder %s799_s22, %s799_s22 }
   0xe   :  { %757 = vmatmul.mubr.msk.f32.gmra.mxu1 %vm153_vm2, %v976_v19  ;;  %351 = vbcast.lane.b32.xlu1 %v349_v18, 256  ;;  %v277_v26 = vrot.slane %v714_v24, %v276_v23  ;;  %v284_v33 = vrot.slane %v270_v27, %v276_v23  ;;  %p806_p3 = por %p805_p2, %p804_p1 }
  0x10   :  { %v288_v32 = vrot.slane %v277_v26, %v939_v11  ;;  %v292_v42 = vrot.slane %v284_v33, %v939_v11  ;;  %v382_v26 = vand.u32 127, %v274_v3  ;;  %p807_p4 = pnand %p806_p3, %p800_p0 }
  0x12   :  { %v387_v27 = vadd.s32 4294967288, %v382_v26 }
  0x7c   :  { %v345_v1 = vpop.permute.xlu1 %344 }
  0x80   :  { %v352_v4 = vpop.permute.xlu1 %351 }
  0xc5   :  { %v741_v25 = vpop.f32.mrf.mxu0 }
  0xc7   :  { %v134_v28 = vpop.f32.mrf.mxu0 }
  0xc9   :  { %v744_v34 = vpop.f32.mrf.mxu0 }
  0xca   :  { %v755_v29 = vpop.f32.mrf.mxu1 }
  0xcb   :  { %v238_v31 = vadd.f32 %v755_v29, %v741_v25  ;;  %v144_v43 = vpop.f32.mrf.mxu0  ;;  %v1002_v29 = vsub.s32 %v382_v26, %v928_v8 }
  0xcc   :  { %v232_v35 = vpop.f32.mrf.mxu1 }
  0xcd   :  { %v259_v36 = vadd.f32 %v713_v30, %v238_v31  ;;  %v233_v37 = vadd.f32 %v232_v35, %v134_v28  ;;  %v1005_v31 = vsub.s32 %v387_v27, %v928_v8 }
  0xce   :  { %v758_v38 = vpop.f32.mrf.mxu1 }
  0xcf   :  { %v296_v39 = vadd.f32 %v288_v32, %v259_v36  ;;  %v258_v40 = vadd.f32 %v713_v30, %v233_v37  ;;  %v248_v41 = vadd.f32 %v758_v38, %v744_v34 }
  0xd0   :  { %v242_v44 = vpop.f32.mrf.mxu1 }
  0xd1   :  { %781 = vtanh.f32 %v296_v39  ;;  %v295_v45 = vadd.f32 %v288_v32, %v258_v40  ;;  %v261_v46 = vadd.f32 %v713_v30, %v248_v41  ;;  %v243_v47 = vadd.f32 %v242_v44, %v144_v43 }
  0xd3   :  { %783 = vtanh.f32 %v295_v45  ;;  %v298_v48 = vadd.f32 %v292_v42, %v261_v46  ;;  %v260_v49 = vadd.f32 %v713_v30, %v243_v47 }
  0xd5   :  { %785 = vtanh.f32 %v298_v48  ;;  %v297_v50 = vadd.f32 %v292_v42, %v260_v49 }
  0xd7   :  { %787 = vtanh.f32 %v297_v50 }
  0xde   :  { %v782_v52 = vpop.eup %781 }
  0xdf   :  { %v311_v53 = vmul.f32 %v782_v52, %v715_v51 }
  0xe0   :  { %v784_v54 = vpop.eup %783 }
  0xe1   :  { %v318_v55 = vsel %vm314_vm3, %v311_v53, 0.0  ;;  %v310_v56 = vmul.f32 %v784_v54, %v715_v51 }
  0xe2   :  { %v786_v57 = vpop.eup %785  ;;  %319 = vadd.xlane.f32.xlu0 %v318_v55 }
  0xe3   :  { %v313_v58 = vmul.f32 %v786_v57, %v715_v51  ;;  %v315_v61 = vsel %vm314_vm3, %v310_v56, 0.0 }
  0xe4   :  { %v788_v59 = vpop.eup %787 }
  0xe5   :  { %v324_v60 = vsel %vm314_vm3, %v313_v58, 0.0  ;;  %v312_v62 = vmul.f32 %v788_v59, %v715_v51 }
  0xe6   :  { %325 = vadd.xlane.f32.xlu1 %v324_v60  ;;  %316 = vadd.xlane.f32.xlu0 %v315_v61 }
  0xe7   :  { %v321_v63 = vsel %vm314_vm3, %v312_v62, 0.0 }
  0xea   :  { %322 = vadd.xlane.f32.xlu1 %v321_v63 }
  0xfb   :  { %355 = vbcast.lane.b32.xlu1 %v349_v18, 264 }
  0xfc   :  { %340 = vbcast.lane.b32.xlu0 %v959_v16, 256 }
 0x16b   :  { %v320_v5 = vpop.xlane.xlu0 %319 }
 0x16c   :  { %v330_v6 = vadd.f32 %v328_v2, %v320_v5 }
 0x16e   :  { %v362_v9 = vadd.f32 %v345_v1, %v330_v6 }
 0x16f   :  { %v326_v10 = vpop.xlane.xlu1 %325  ;;  %v317_v12 = vpop.xlane.xlu0 %316 }
 0x170   :  { %373 = vperm.xlu1 %779, %v362_v9   ;;  %v329_v13 = vadd.f32 %v328_v2, %v317_v12  ;;  %v332_v18 = vadd.f32 %v328_v2, %v326_v10 }
 0x173   :  { %v323_v20 = vpop.xlane.xlu1 %322  ;;  %v341_v21 = vpop.permute.xlu0 %340 }
 0x174   :  { %v331_v22 = vadd.f32 %v328_v2, %v323_v20  ;;  %v361_v23 = vadd.f32 %v341_v21, %v329_v13 }
 0x176   :  { %v363_v24 = vadd.f32 %v352_v4, %v331_v22  ;;  %370 = vperm.xlu0 %780, %v361_v23   ;;  %v845_v4 = vmov 0.0  }
 0x177   :  { %v356_v16 = vpop.permute.xlu1 %355  ;;  %759 = vmatprep.subr.mxu0 %v845_v4  ;;  %763 = vmatprep.mubr.msk.f32.mxu0 %vm846_vm7, %v845_v4 }
 0x178   :  { %v364_v25 = vadd.f32 %v356_v16, %v332_v18  ;;  %376 = vperm.xlu1 %779, %v363_v24   ;;  %760 = vmatpush3.msra.mxu0 %v955_v15 }
 0x179   :  { %761 = vmatprep.subr.mxu0 %v845_v4 }
 0x17a   :  { %379 = vperm.xlu0 %780, %v364_v25   ;;  %762 = vmatpush3.msra.mxu0 %v925_v7 }
 0x17b   :  { %766 = vmatprep.subr.mxu0 %v845_v4 }
 0x1eb   :  { %v374_v28 = vpop.permute.xlu1 %373 }
 0x1ec   :  { %v391_v35 = vrot.slane %v374_v28, %v1005_v31 }
 0x1f1   :  { %v371_v30 = vpop.permute.xlu0 %370 }
 0x1f2   :  { %v386_v33 = vrot.slane %v371_v30, %v1002_v29 }
 0x1f3   :  { %v377_v32 = vpop.permute.xlu1 %376 }
 0x1f4   :  { %v397_v36 = vrot.slane %v377_v32, %v1002_v29  ;;  %v393_v37 = vsel %vm392_vm4, %v391_v35, %v386_v33 }
 0x1f5   :  { %v380_v34 = vpop.permute.xlu0 %379 }
 0x1f6   :  { %v401_v3 = vrot.slane %v380_v34, %v1005_v31 }
 0x1f8   :  { %v402_v38 = vsel %vm392_vm4, %v401_v3, %v397_v36 }
 0x1f9   :  { %v404_v8 = vsel %vm403_vm5, %v402_v38, %v393_v37 }
 0x1fa   :  { %v407_v39 = vsel %vm406_vm6, %v404_v8, -inf }
 0x1fb   :  { %408 = vmax.xlane.f32.xlu1 %v407_v39 }
 0x284   :  { %v409_v40 = vpop.xlane.xlu1 %408 }
 0x285   :  { %v414_v41 = vrot.slane %v409_v40, %v939_v11  ;;  %v418_v42 = vrot.slane %v409_v40, %v950_v14 }
 0x287   :  { %v421_v43 = vsub.f32 %v361_v23, %v414_v41  ;;  %v422_v44 = vsub.f32 %v362_v9, %v414_v41  ;;  %v423_v46 = vsub.f32 %v363_v24, %v418_v42  ;;  %v424_v48 = vsub.f32 %v364_v25, %v418_v42 }
 0x289   :  { %v425_v45 = vmul.f32 1.442695, %v421_v43  ;;  %v427_v47 = vmul.f32 1.442695, %v422_v44  ;;  %v429_v49 = vmul.f32 1.442695, %v423_v46 }
 0x28a   :  { %v431_v50 = vmul.f32 1.442695, %v424_v48 }
 0x28b   :  { %789 = vpow2.f32 %v425_v45 }
 0x28c   :  { %791 = vpow2.f32 %v427_v47 }
 0x28d   :  { %793 = vpow2.f32 %v429_v49 }
 0x28e   :  { %795 = vpow2.f32 %v431_v50 }
 0x298   :  { %v790_v51 = vpop.eup %789 }
 0x299   :  { %438 = vperm.xlu0 %780, %v790_v51   ;;  %v792_v52 = vpop.eup %791 }
 0x29a   :  { %v794_v53 = vpop.eup %793 }
 0x29b   :  { %v796_v54 = vpop.eup %795 }
 0x29d   :  { %441 = vperm.xlu0 %780, %v792_v52  }
 0x2a1   :  { %444 = vperm.xlu0 %780, %v794_v53  }
 0x2a5   :  { %447 = vperm.xlu0 %780, %v796_v54  }
 0x314   :  { %v439_v55 = vpop.permute.xlu0 %438 }
 0x315   :  { %v452_v60 = vrot.slane %v439_v55, %v1002_v29 }
 0x318   :  { %v442_v56 = vpop.permute.xlu0 %441 }
 0x319   :  { %v456_v58 = vrot.slane %v442_v56, %v1005_v31 }
 0x31b   :  { %v457_v63 = vsel %vm392_vm4, %v456_v58, %v452_v60 }
 0x31c   :  { %v445_v57 = vpop.permute.xlu0 %444 }
 0x31d   :  { %v461_v61 = vrot.slane %v445_v57, %v1002_v29 }
 0x320   :  { %v448_v59 = vpop.permute.xlu0 %447 }
 0x321   :  { %v465_v62 = vrot.slane %v448_v59, %v1005_v31 }
 0x323   :  { %v466_v0 = vsel %vm392_vm4, %v465_v62, %v461_v61 }
 0x324   :  { %v467_v1 = vsel %vm403_vm5, %v466_v0, %v457_v63 }
 0x325   :  { %v469_v2 = vsel %vm406_vm6, %v467_v1, 0.0 }
 0x326   :  { %470 = vadd.xlane.f32.xlu0 %v469_v2 }
 0x3af   :  { %v471_v5 = vpop.xlane.xlu0 %470 }
 0x3b0   :  { %797 = vrcp.f32 %v471_v5 }
 0x3bd   :  { %v798_v6 = vpop.eup %797 }
 0x3be   :  { %v477_v9 = vrot.slane %v798_v6, %v939_v11  ;;  %v481_v13 = vrot.slane %v798_v6, %v950_v14 }
 0x3c0   :  { %v485_v10 = vmul.f32 %v792_v52, %v477_v9  ;;  %v484_v12 = vmul.f32 %v790_v51, %v477_v9  ;;  %v486_v20 = vmul.f32 %v794_v53, %v481_v13  ;;  %v487_v15 = vmul.f32 %v796_v54, %v481_v13 }
 0x3c2   :  { %494 = vperm.xlu0 %780, %v485_v10   ;;  %491 = vperm.xlu1 %779, %v484_v12  }
 0x3c6   :  { %580 = vperm.xlu1 %779, %v486_v20  }
 0x3ca   :  { %583 = vperm.xlu1 %779, %v487_v15  }
 0x43d   :  { %v495_v21 = vpop.permute.xlu0 %494  ;;  %v492_v7 = vpop.permute.xlu1 %491 }
 0x43e   :  { %v503_v22 = vrot.slane %v495_v21, %v1005_v31  ;;  %v499_v23 = vrot.slane %v492_v7, %v1002_v29 }
 0x440   :  { %v504_v11 = vsel %vm392_vm4, %v503_v22, %v499_v23 }
 0x441   :  { %764 = vmatmul.mubr.msk.f32.vlgmr.msra.gmra.mxu0 %vm314_vm3, %v504_v11  ;;  %v581_v18 = vpop.permute.xlu1 %580 }
 0x442   :  { %767 = vmatpush3.msra.mxu0 %v976_v19  ;;  %770 = vmatprep.mubr.msk.f32.mxu0 %vm846_vm7, %v845_v4  ;;  %v588_v24 = vrot.slane %v581_v18, %v1002_v29 }
 0x443   :  { %768 = vmatprep.subr.mxu0 %v845_v4 }
 0x444   :  { %769 = vmatpush3.msra.mxu0 %v964_v17 }
 0x445   :  { %v584_v14 = vpop.permute.xlu1 %583 }
 0x446   :  { %v592_v16 = vrot.slane %v584_v14, %v1005_v31 }
 0x448   :  { %v593_v25 = vsel %vm392_vm4, %v592_v16, %v588_v24 }
 0x449   :  { %771 = vmatmul.mubr.msk.f32.vlgmr.msra.gmra.mxu0 %vm314_vm3, %v593_v25  ;;  %v673_v26 = vsel %vm403_vm5, %v593_v25, %v504_v11 }
 0x44a   :  { %675 = vst.msk [vmem:[#allocation5] sm:$0x3] %vm406_vm6, %v673_v26 }
 0x44b   :  { %810 = shalt.err (!%p807_p4)
}
 0x44c   :  { %695 = dma.vmem_to_hbm [thread:$0]  %s693_s21, 32, %s1058_s10, [#allocation6]   ;;  %vm671_vm8 = vcmask 254976  }
 0x44d   :  { %s848_s6 = smov [#allocation3]  }
 0x44e   :  { %s682_s25 = sshll.u32 %s848_s6, 4  ;;  %s683_s25 = int_to_ptr.vmem [resolvable:$true] %s682_s25 }
 0x44f   :  { %s819_s26 = scalar_lea.vmem %s683_s25, 32  ;;  %p824_p6 = scmp.lt.s32.totalorder %s683_s25, %s683_s25 }
 0x450   :  { %p820_p5 = scmp.ne.s32.totalorder %s683_s25, %s819_s26  ;;  %p825_p7 = scmp.lt.s32.totalorder %s819_s26, %s819_s26 }
 0x452   :  { %p826_p8 = por %p825_p7, %p824_p6 }
 0x454   :  { %p827_p9 = pnand %p826_p8, %p820_p5 }
 0x501   :  { %v573_v17 = vpop.f32.mrf.mxu0 }
 0x503   :  { %v765_v19 = vpop.f32.mrf.mxu0 }
 0x509   :  { %v662_v27 = vpop.f32.mrf.mxu0 }
 0x50a   :  { %v668_v28 = vrot.slane %v662_v27, 7 }
 0x50b   :  { %v772_v29 = vpop.f32.mrf.mxu0 }
 0x50c   :  { %v669_v30 = vsel %vm403_vm5, %v668_v28, %v573_v17 }
 0x50d   :  { %672 = vst.msk [vmem:[#allocation3] sm:$0x3] %vm671_vm8, %v669_v30 }
 0x50e   :  { %830 = shalt.err (!%p827_p9)
}
 0x50f   :  { %685 = dma.vmem_to_hbm [thread:$0]  %s683_s25, 32, %s1057_s9, [#allocation4]  }
 0x510   :  { %839 = dma.done.wait [#allocation4], 32  }
 0x511   :  { %840 = vsyncadd [#allocation4], 4294967264 }
 0x512   :  { %841 = dma.done.wait [#allocation6], 32  }
 0x513   :  { %842 = vsyncadd [#allocation6], 4294967264 }
 0x514   :  { %702 = vsyncpa [#allocation4], 1 }
 0x515   :  { %703 = vsyncpa [#allocation6], 1 }

</bundles_post_ra>
